<compile_context>
chip_gen: v6e
topology: v6e:2x2x1
jax: 0.10.0
libtpu: 0.0.40
codegen_flags: <defaults>
</compile_context>

<pallas_src>
import jax
import jax.numpy as jnp
from jax.experimental import pallas as pl
from jax.experimental.pallas import tpu as pltpu


def _round_up(x, m):
    return ((x + m - 1) // m) * m


def _patch_embed_kernel(p_ref, w_ref, b_ref, o_ref):
    # p_ref: (tm, K_pad)  bf16 patches tile (streams along M)
    # w_ref: (K_pad, tn)  bf16 projection tile (resident across the M sweep)
    # b_ref: (1, tn)      f32 bias tile (resident across the M sweep)
    # o_ref: (tm, tn)     output tile in x.dtype
    acc = jnp.dot(p_ref[...], w_ref[...], preferred_element_type=jnp.float32)
    o_ref[...] = (acc + b_ref[...]).astype(o_ref.dtype)


def _pick_tiles(M, K_pad, N_pad, out_itemsize, budget_bytes=12 * 1024 * 1024):
    """Largest (tm, tn) whose double-buffered tiles fit a conservative VMEM budget."""
    if N_pad <= 1024:
        tn = N_pad                                   # weight fully resident
    else:
        tn = max(t for t in (512, 384, 256, 128) if N_pad % t == 0)
    tm = min(512, _round_up(M, 8))

    def dbuf_bytes(tm_, tn_):
        # 2x for Pallas double buffering of every tiled operand.
        return 2 * (tm_ * K_pad * 2          # bf16 patches tile
                    + K_pad * tn_ * 2        # bf16 weight tile
                    + tn_ * 4                # f32 bias tile
                    + tm_ * tn_ * out_itemsize)

    while dbuf_bytes(tm, tn) > budget_bytes and tm > 8:
        tm = max(8, _round_up(tm // 2, 8))
    while dbuf_bytes(tm, tn) > budget_bytes and tn > 128:
        tn = [t for t in range(128, tn, 128) if N_pad % t == 0][-1]
    return tm, tn


def patch_embed_forward(x, weight, bias, patch_size):
    """x: (B, C, H, W) NCHW. weight: (embed_dim, C, P, P). bias: (embed_dim,).

    Returns (B, num_patches, embed_dim), same as
    nn.Conv2d(C, embed_dim, kernel_size=P, stride=P)(x).flatten(2).transpose(1, 2).
    """
    B, C, H, W = x.shape
    P = patch_size
    E = weight.shape[0]
    gh, gw = H // P, W // P
    num_patches = gh * gw
    out_dtype = x.dtype

    # --- glue: extract non-overlapping patches, flatten in (c, kh, kw) order
    #     so it matches the PyTorch conv-weight flattening. Done in bf16.
    xb = x.astype(jnp.bfloat16)
    patches = xb.reshape(B, C, gh, P, gw, P)
    patches = patches.transpose(0, 2, 4, 1, 3, 5)              # (B, gh, gw, C, P, P)
    patches = patches.reshape(B * num_patches, C * P * P)       # (M, K) bf16

    M, K = patches.shape

    # Lane-dense padding: K and N to multiples of 128 (zero pad -> exact math).
    K_pad = _round_up(K, 128)
    N_pad = _round_up(E, 128)
    out_itemsize = jnp.dtype(out_dtype).itemsize

    tm, tn = _pick_tiles(M, K_pad, N_pad, out_itemsize)
    M_pad = _round_up(M, tm)                                    # every M block is full

    if (M_pad, K_pad) != (M, K):
        patches = jnp.pad(patches, ((0, M_pad - M), (0, K_pad - K)))
    w_mat = weight.reshape(E, K).T.astype(jnp.bfloat16)         # (K, E) bf16
    b_mat = bias.astype(jnp.float32).reshape(1, E)
    if (K_pad, N_pad) != (K, E):
        w_mat = jnp.pad(w_mat, ((0, K_pad - K), (0, N_pad - E)))
        b_mat = jnp.pad(b_mat, ((0, 0), (0, N_pad - E)))

    n_tiles_n = N_pad // tn
    n_tiles_m = M_pad // tm
    grid = (n_tiles_n, n_tiles_m)                               # M innermost

    bytes_accessed = (n_tiles_n * M_pad * K_pad * 2             # bf16 patches (per N sweep)
                      + K_pad * N_pad * 2                       # bf16 weight (once)
                      + N_pad * 4                               # f32 bias
                      + M_pad * N_pad * out_itemsize)           # output

    out = pl.pallas_call(
        _patch_embed_kernel,
        out_shape=jax.ShapeDtypeStruct((M_pad, N_pad), out_dtype),
        grid_spec=pltpu.PrefetchScalarGridSpec(
            num_scalar_prefetch=0,
            grid=grid,
            in_specs=[
                pl.BlockSpec((tm, K_pad), lambda n, m: (m, 0)),   # stream along M
                pl.BlockSpec((K_pad, tn), lambda n, m: (0, n)),   # resident in M sweep
                pl.BlockSpec((1, tn), lambda n, m: (0, n)),       # resident in M sweep
            ],
            out_specs=pl.BlockSpec((tm, tn), lambda n, m: (m, n)),
        ),
        compiler_params=pltpu.CompilerParams(
            dimension_semantics=("parallel", "parallel")),
        cost_estimate=pl.CostEstimate(
            flops=2 * M_pad * K_pad * N_pad,
            transcendentals=0,
            bytes_accessed=bytes_accessed),
    )(patches, w_mat, b_mat)

    if (M_pad, N_pad) != (M, E):
        out = out[:M, :E]
    return out.reshape(B, num_patches, E)


if __name__ == "__main__":
    # Small shapes consistent with the module's forward:
    #   img_size=16, patch_size=8, in_chans=4, embed_dim=32, batch=2
    B, C, H, W = 2, 4, 16, 16
    P = 8
    E = 32

    key = jax.random.PRNGKey(0)
    kx, kw, kb = jax.random.split(key, 3)

    x = jax.random.normal(kx, (B, C, H, W), dtype=jnp.float32)
    # Deterministic synthetic parameters (Conv2d weight/bias shapes).
    weight = jax.random.normal(kw, (E, C, P, P), dtype=jnp.float32) * 0.02
    bias = jax.random.normal(kb, (E,), dtype=jnp.float32) * 0.02

    out = patch_embed_forward(x, weight, bias, P)
    out = jax.block_until_ready(out)

    # Reference check (pure JAX, f32): same patch-matmul formulation.
    gh, gw = H // P, W // P
    ref_patches = x.reshape(B, C, gh, P, gw, P).transpose(0, 2, 4, 1, 3, 5)
    ref_patches = ref_patches.reshape(B, gh * gw, C * P * P)
    ref = jnp.einsum("bmk,ek->bme", ref_patches, weight.reshape(E, -1)) + bias

    assert out.shape == (B, (H // P) * (W // P), E), out.shape
    # bf16 inputs on the MXU (f32 accumulation): loosened tolerance vs f32 ref.
    assert jnp.allclose(out, ref, atol=1e-2, rtol=1e-2), "mismatch vs reference"

    print("KERNEL_OK")
</pallas_src>

<mosaic_0001>
module attributes {stable_mosaic.version = 11 : i64} {
  func.func @_patch_embed_kernel(%arg0: i32, %arg1: i32, %arg2: memref<8x256xbf16, #tpu.memory_space<vmem>>, %arg3: memref<256x128xbf16, #tpu.memory_space<vmem>>, %arg4: memref<1x128xf32, #tpu.memory_space<vmem>>, %arg5: memref<8x128xf32, #tpu.memory_space<vmem>>) attributes {dimension_semantics = [#tpu.dimension_semantics<parallel>, #tpu.dimension_semantics<parallel>], iteration_bounds = array<i64: 1, 1>, scalar_prefetch = 0 : i64, scratch_operands = 0 : i64, tpu.core_type = #tpu.core_type<tc>, window_params = [{transform_indices = @transform_0, window_bounds = array<i64: 8, 256>}, {transform_indices = @transform_1, window_bounds = array<i64: 256, 128>}, {transform_indices = @transform_2, window_bounds = array<i64: 1, 128>}, {transform_indices = @transform_3, window_bounds = array<i64: 8, 128>}]} {
    %c0 = arith.constant 0 : index
    %c0_0 = arith.constant 0 : index
    %0 = vector.load %arg2[%c0, %c0_0] : memref<8x256xbf16, #tpu.memory_space<vmem>>, vector<8x256xbf16>
    %c0_1 = arith.constant 0 : index
    %c0_2 = arith.constant 0 : index
    %1 = vector.load %arg3[%c0_1, %c0_2] : memref<256x128xbf16, #tpu.memory_space<vmem>>, vector<256x128xbf16>
    %cst = arith.constant dense<0.000000e+00> : vector<8x128xf32>
    %2 = tpu.matmul %0, %1, %cst {dimension_numbers = #tpu.dot_dimension_numbers<[1], [0], [0], [1], [0, 0, 1, 1], [], []>} : vector<8x256xbf16>, vector<256x128xbf16>, vector<8x128xf32> -> vector<8x128xf32>
    %c0_3 = arith.constant 0 : index
    %c0_4 = arith.constant 0 : index
    %3 = vector.load %arg4[%c0_3, %c0_4] : memref<1x128xf32, #tpu.memory_space<vmem>>, vector<1x128xf32>
    %4 = vector.broadcast %3 : vector<1x128xf32> to vector<8x128xf32>
    %5 = arith.addf %2, %4 : vector<8x128xf32>
    %c0_5 = arith.constant 0 : index
    %c0_6 = arith.constant 0 : index
    %6 = vector.load %arg5[%c0_5, %c0_6] : memref<8x128xf32, #tpu.memory_space<vmem>>, vector<8x128xf32>
    tpu.vector_store %arg5[%c0_5, %c0_6], %5 {strides = array<i32>} : memref<8x128xf32, #tpu.memory_space<vmem>>, vector<8x128xf32>,
    return
  }
  func.func @transform_0(%arg0: i32, %arg1: i32) -> (i32, i32) {
    %c0_i32 = arith.constant 0 : i32
    %c0_i32_0 = arith.constant 0 : i32
    return %arg1, %c0_i32 : i32, i32
  }
  func.func @transform_1(%arg0: i32, %arg1: i32) -> (i32, i32) {
    %c0_i32 = arith.constant 0 : i32
    %c0_i32_0 = arith.constant 0 : i32
    return %c0_i32, %arg0 : i32, i32
  }
  func.func @transform_2(%arg0: i32, %arg1: i32) -> (i32, i32) {
    %c0_i32 = arith.constant 0 : i32
    %c0_i32_0 = arith.constant 0 : i32
    return %c0_i32, %arg0 : i32, i32
  }
  func.func @transform_3(%arg0: i32, %arg1: i32) -> (i32, i32) {
    %c0_i32 = arith.constant 0 : i32
    return %arg1, %arg0 : i32, i32
  }
}

</mosaic_0001>

<bundles_post_ra>
// kernel: tpu_custom_call.1
= control target key start
LH: loop header
LB: loop body
LE: loop exit
PB: predicated region body
PF: predicated region fallthrough
CT: control target
= control target key end

     0   :  { %8 = vsyncpa [#allocation3], 0  ;;  %s409_s0 = inlined_call_operand.hbm [shape: bf16[8,256], index: 0, kind: input, shape index: {}]   ;;  %s410_s1 = inlined_call_operand.hbm [shape: bf16[256,128], index: 1, kind: input, shape index: {}]   ;;  %s411_s2 = inlined_call_operand.vmem [shape: f32[1,128], index: 2, kind: input, shape index: {}]   ;;  %s412_s3 = inlined_call_operand.hbm [shape: f32[8,128], index: 3, kind: output, shape index: {}]  }
   0x1   :  { %9 = vsyncpa [#allocation6], 0 }
   0x2   :  { %10 = vsyncpa [#allocation4], 0  ;;  %s372_s12 = smov [#allocation2]   ;;  %s373_s14 = smov [#allocation5]  }
   0x3   :  { %s17_s13 = sshll.u32 %s372_s12, 4  ;;  %s26_s15 = sshll.u32 %s373_s14, 4  ;;  %s18_s13 = int_to_ptr.vmem [resolvable:$true] %s17_s13  ;;  %s27_s15 = int_to_ptr.vmem [resolvable:$true] %s26_s15 }
   0x4   :  { %s314_s16 = scalar_lea.vmem %s18_s13, 128  ;;  %p319_p1 = scmp.lt.s32.totalorder %s18_s13, %s18_s13 }
   0x5   :  { %p315_p0 = scmp.ne.s32.totalorder %s18_s13, %s314_s16  ;;  %p320_p2 = scmp.lt.s32.totalorder %s314_s16, %s314_s16 }
   0x7   :  { %p321_p3 = por %p320_p2, %p319_p1 }
   0x9   :  { %p322_p4 = pnand %p321_p3, %p315_p0 }
   0xb   :  { %325 = shalt.err (!%p322_p4)
}
   0xc   :  { %20 = dma.hbm_to_vmem [thread:$0]  %s409_s0, 128, %s18_s13, [#allocation3]  }
   0xd   :  { %s334_s19 = scalar_lea.vmem %s27_s15, 2048  ;;  %p339_p6 = scmp.lt.s32.totalorder %s27_s15, %s27_s15 }
   0xe   :  { %p335_p5 = scmp.ne.s32.totalorder %s27_s15, %s334_s19  ;;  %p340_p7 = scmp.lt.s32.totalorder %s334_s19, %s334_s19 }
  0x10   :  { %p341_p8 = por %p340_p7, %p339_p6 }
  0x12   :  { %p342_p9 = pnand %p341_p8, %p335_p5 }
  0x14   :  { %345 = shalt.err (!%p342_p9)
}
  0x15   :  { %s374_s20 = smov 64   ;;  %s375_s21 = smov 4  }
  0x16   :  { %32 = dma.hbm_to_vmem [thread:$0]  %s410_s1, 2048, %s27_s15, [#allocation6], %s374_s20, %s374_s20, %s375_s21  }
  0x17   :  { %366 = dma.done.wait [#allocation3], 128  }
  0x18   :  { %367 = vsyncadd [#allocation3], 4294967168 }
  0x19   :  { %368 = dma.done.wait [#allocation6], 2048  }
  0x1a   :  { %369 = vsyncadd [#allocation6], 4294965248  ;;  %v288_v0 = vld [vmem:[#allocation5 + $0x78] sm:$0xff]   ;;  %v290_v2 = vld [vmem:[#allocation5 + $0x70] sm:$0xff]   ;;  %s376_s24 = smov [#allocation7]  }
  0x1b   :  { %v289_v1 = vld [vmem:[#allocation5 + $0x38] sm:$0xff]   ;;  %261 = vmatprep.subr.bf16.mxu0 %v288_v0  ;;  %v291_v3 = vld [vmem:[#allocation5 + $0x30] sm:$0xff]   ;;  %v292_v4 = vld [vmem:[#allocation5 + $0x68] sm:$0xff]   ;;  %s232_s25 = sshll.u32 %s376_s24, 4  ;;  %s233_s25 = int_to_ptr.vmem [resolvable:$true] %s232_s25 }
  0x1c   :  { %262 = vmatpush3.bf16.msra.mxu0 %v289_v1  ;;  %v293_v5 = vld [vmem:[#allocation5 + $0x28] sm:$0xff]   ;;  %v294_v6 = vld [vmem:[#allocation5 + $0x60] sm:$0xff]   ;;  %v296_v8 = vld [vmem:[#allocation5 + $0x58] sm:$0xff]   ;;  %s346_s26 = scalar_lea.vmem %s233_s25, 128  ;;  %p351_p11 = scmp.lt.s32.totalorder %s233_s25, %s233_s25 }
  0x1d   :  { %263 = vmatprep.subr.bf16.mxu0 %v290_v2  ;;  %v295_v7 = vld [vmem:[#allocation5 + $0x20] sm:$0xff]   ;;  %v297_v9 = vld [vmem:[#allocation5 + $0x18] sm:$0xff]   ;;  %v298_v10 = vld [vmem:[#allocation5 + $0x50] sm:$0xff]   ;;  %p347_p10 = scmp.ne.s32.totalorder %s233_s25, %s346_s26  ;;  %p352_p12 = scmp.lt.s32.totalorder %s346_s26, %s346_s26 }
  0x1e   :  { %v42_v11 = vld [vmem:[#allocation2] sm:$0xff]  ;;  %v299_v13 = vld [vmem:[#allocation5 + $0x10] sm:$0xff]   ;;  %v300_v14 = vld [vmem:[#allocation5 + $0x48] sm:$0xff]  }
  0x1f   :  { %v244_v12 = vcombine.high %v42_v11, %v42_v11  ;;  %v301_v15 = vld [vmem:[#allocation5 + $0x8] sm:$0xff]   ;;  %v302_v16 = vld [vmem:[#allocation5 + $0x40] sm:$0xff]   ;;  %v243_v18 = vcombine.low %v42_v11, %v42_v11  ;;  %v242_v20 = vld [vmem:[%s411_s2] ss:$0 sm:$0xff]  ;;  %p353_p13 = por %p352_p12, %p351_p11 }
  0x20   :  { %264 = vmatpush3.bf16.msra.mxu0 %v291_v3  ;;  %v303_v17 = vld [vmem:[#allocation5] sm:$0xff]  }
  0x21   :  { %265 = vmatprep.subr.bf16.mxu0 %v292_v4  ;;  %217 = vmatprep.mubr.bf16.mxu0 %v244_v12  ;;  %p354_p0 = pnand %p353_p13, %p347_p10 }
  0x24   :  { %266 = vmatpush3.bf16.msra.mxu0 %v293_v5 }
  0x25   :  { %267 = vmatprep.subr.bf16.mxu0 %v294_v6 }
  0x28   :  { %268 = vmatpush3.bf16.msra.mxu0 %v295_v7 }
  0x29   :  { %269 = vmatprep.subr.bf16.mxu0 %v296_v8 }
  0x2c   :  { %270 = vmatpush3.bf16.msra.mxu0 %v297_v9 }
  0x2d   :  { %271 = vmatprep.subr.bf16.mxu0 %v298_v10 }
  0x30   :  { %272 = vmatpush3.bf16.msra.mxu0 %v299_v13 }
  0x31   :  { %273 = vmatprep.subr.bf16.mxu0 %v300_v14 }
  0x34   :  { %274 = vmatpush3.bf16.msra.mxu0 %v301_v15 }
  0x35   :  { %275 = vmatprep.subr.bf16.mxu0 %v302_v16 }
  0x38   :  { %276 = vmatpush3.bf16.msra.mxu0 %v303_v17 }
  0x3b   :  { %218 = vmatmul.mubr.bf16.vlgmr.msra.gmra.mxu0 %v243_v18 }
  0xfb   :  { %v277_v19 = vpop.f32.mrf.mxu0 }
  0xfd   :  { %v278_v21 = vpop.f32.mrf.mxu0 }
  0xfe   :  { %v279_v22 = vadd.f32 %v278_v21, %v277_v19 }
  0xff   :  { %v280_v23 = vpop.f32.mrf.mxu0 }
 0x100   :  { %v220_v24 = vadd.f32 %v279_v22, %v242_v20 }
 0x101   :  { %v281_v25 = vpop.f32.mrf.mxu0 }
 0x102   :  { %225 = vst [vmem:[#allocation7] sm:$0xff] %v220_v24 }
 0x103   :  { %357 = shalt.err (!%p354_p0)
}
 0x104   :  { %235 = dma.vmem_to_hbm [thread:$0]  %s233_s25, 128, %s412_s3, [#allocation4]  }
 0x105   :  { %370 = dma.done.wait [#allocation4], 128  }
 0x106   :  { %371 = vsyncadd [#allocation4], 4294967168 }
 0x107   :  { %239 = vsyncpa [#allocation3], 1 }
 0x108   :  { %240 = vsyncpa [#allocation6], 1 }
 0x109   :  { %241 = vsyncpa [#allocation4], 1 }

</bundles_post_ra>
